<compile_context>
chip_gen: v5e
topology: v5e:2x2
jax: 0.10.0
libtpu: 0.0.40
codegen_flags: <defaults>
</compile_context>

<pallas_src>
import jax
import jax.numpy as jnp
from jax.experimental import pallas as pl
from jax.experimental.pallas import tpu as pltpu


# ----------------------------------------------------------------------------
# Fused decoder-step kernel (single invocation, everything resident in VMEM)
# ----------------------------------------------------------------------------
def _decoder_step_kernel(tok_ref, emb_tbl_ref, enc_ref, state_ref, small_ref,
                         w_lstm_ref, w_fc_ref,
                         pred_ref, state_out_ref, x_scr):
    T, B, H2 = enc_ref.shape                        # H2 == 2H
    H = state_ref.shape[-1] // 2
    E = emb_tbl_ref.shape[1]
    V_in = emb_tbl_ref.shape[0]
    V = pred_ref.shape[-1]

    h_prev = state_ref[:, 0:H]                      # (B, H)  f32
    c_prev = state_ref[:, H:2 * H]                  # (B, H)  f32
    enc = enc_ref[...]                              # (T, B, 2H) f32

    # ---- embedding lookup fused in-kernel: one-hot @ table on the MXU --------
    tok = tok_ref[...]                                              # (B, 1) int32
    lane = jax.lax.broadcasted_iota(jnp.int32, (B, V_in), 1)        # (B, V_in)
    onehot = jnp.where(lane == tok, 1.0, 0.0).astype(jnp.bfloat16)  # (B, V_in)
    emb = jnp.dot(onehot, emb_tbl_ref[...],
                  preferred_element_type=jnp.float32)               # (B, E) f32
    # TODO(synk): nn.Dropout is eval-mode identity here; training-mode mask not implemented.

    # ---- attention energies: relu(<[h, enc_t], w_att> + b_att) ---------------
    w_h = small_ref[0:1, 0:H]                       # (1, H)
    w_e = small_ref[0:1, H:3 * H]                   # (1, 2H)
    b_att = small_ref[0:1, 3 * H:3 * H + 1]         # (1, 1)

    score_h = jnp.sum(h_prev * w_h, axis=-1, keepdims=True)             # (B, 1)
    score_e = jnp.sum(enc * w_e, axis=-1, keepdims=True)                # (T, B, 1)
    energy = jnp.maximum(score_e + score_h[None, :, :] + b_att, 0.0)    # (T, B, 1)

    # ---- softmax over time (dim 0) --------------------------------------------
    m = jnp.max(energy, axis=0, keepdims=True)                          # (1, B, 1)
    p = jnp.exp(energy - m)                                             # (T, B, 1)
    denom = jnp.sum(p, axis=0, keepdims=True)                           # (1, B, 1)
    attn = p * pl.reciprocal(denom, approx=True)                        # (T, B, 1)

    # ---- context vector: bmm(attn, enc) == sum_t attn[t] * enc[t] -------------
    context = jnp.sum(attn * enc, axis=0)                               # (B, 2H) f32

    # ---- one LSTM step: single fused MXU pass [ctx | emb | h] @ [W_ih ; W_hh] --
    x_scr[:, 0:H2] = context.astype(jnp.bfloat16)
    x_scr[:, H2:H2 + E] = emb.astype(jnp.bfloat16)
    x_scr[:, H2 + E:H2 + E + H] = h_prev.astype(jnp.bfloat16)
    gates = (jnp.dot(x_scr[...], w_lstm_ref[...],
                     preferred_element_type=jnp.float32)
             + small_ref[1:2, 0:4 * H])                                 # (B, 4H) f32

    i = jax.nn.sigmoid(gates[:, 0 * H:1 * H])       # PyTorch gate order i|f|g|o
    f = jax.nn.sigmoid(gates[:, 1 * H:2 * H])
    g = jnp.tanh(gates[:, 2 * H:3 * H])
    o = jax.nn.sigmoid(gates[:, 3 * H:4 * H])

    c_new = f * c_prev + i * g
    h_new = o * jnp.tanh(c_new)

    # ---- output projection -----------------------------------------------------
    pred = (jnp.dot(h_new.astype(jnp.bfloat16), w_fc_ref[...],
                    preferred_element_type=jnp.float32)
            + small_ref[2:3, 0:V])                                      # (B, V) f32
    pred_ref[...] = pred.astype(pred_ref.dtype)
    state_out_ref[:, 0:H] = h_new.astype(state_out_ref.dtype)
    state_out_ref[:, H:2 * H] = c_new.astype(state_out_ref.dtype)


def _decoder_step(tok, emb_tbl, enc, state, small, w_lstm, w_fc):
    """tok (B,1) i32; enc (T,B,2H); state (B,2H)=[h|c] -> (pred (B,V), state_new (B,2H))."""
    B = tok.shape[0]
    H2 = state.shape[-1]
    K = w_lstm.shape[0]                      # 2H + E + H
    V = w_fc.shape[1]

    vmem = pl.BlockSpec(memory_space=pltpu.MemorySpace.VMEM)

    return pl.pallas_call(
        _decoder_step_kernel,
        out_shape=(
            jax.ShapeDtypeStruct((B, V), jnp.float32),
            jax.ShapeDtypeStruct((B, H2), jnp.float32),
        ),
        in_specs=[vmem] * 7,                 # tok, emb_tbl, enc, state, small, w_lstm, w_fc
        out_specs=(vmem, vmem),
        scratch_shapes=[pltpu.VMEM((B, K), jnp.bfloat16)],
        input_output_aliases={3: 1},         # state input buffer reused for state output
    )(tok, emb_tbl, enc, state, small, w_lstm, w_fc)


# ----------------------------------------------------------------------------
# Parameter init (weights stored in the "math" orientation the kernel expects)
# ----------------------------------------------------------------------------
def init_decoder_params(key, input_size, embedding_size, hidden_size, output_size):
    H, E, V = hidden_size, embedding_size, output_size
    ks = jax.random.split(key, 8)

    def u(k, shape, scale):
        return jax.random.uniform(k, shape, jnp.float32, -scale, scale)

    s_att = 1.0 / ((3 * H) ** 0.5)
    s_lstm = 1.0 / (H ** 0.5)

    # nn.Linear(3H, 1): flattened weight [w_h(H) | w_e(2H)] in torch cat((h, enc)) order.
    w_att = u(ks[1], (3 * H,), s_att)
    b_att = u(ks[2], (1,), s_att)
    b_lstm = u(ks[3], (4 * H,), s_lstm) + u(ks[4], (4 * H,), s_lstm)   # b_ih + b_hh
    b_fc = u(ks[5], (V,), s_lstm)

    # Pack the small params into one lane-dense (3, W) f32 slab (single DMA).
    W = max(3 * H + 1, 4 * H, V)
    W = ((W + 127) // 128) * 128
    small = jnp.zeros((3, W), jnp.float32)
    small = small.at[0, :3 * H].set(w_att)
    small = small.at[0, 3 * H].set(b_att[0])
    small = small.at[1, :4 * H].set(b_lstm)
    small = small.at[2, :V].set(b_fc)

    return {
        # nn.Embedding(input_size, E)  (bf16 MXU operand)
        "embedding": jax.random.normal(ks[0], (input_size, E), jnp.float32).astype(jnp.bfloat16),
        # packed: row0 = [w_att_h | w_att_e | b_att], row1 = b_lstm (pre-summed), row2 = b_fc
        "small": small,
        # nn.LSTM(2H+E, H): stacked [W_ih^T ; W_hh^T] -> (2H+E+H, 4H), rows ordered [ctx|emb|h]
        "w_lstm": u(ks[6], (2 * H + E + H, 4 * H), s_lstm).astype(jnp.bfloat16),
        # nn.Linear(H, V)
        "w_fc": u(ks[7], (H, V), s_lstm).astype(jnp.bfloat16),
    }


# ----------------------------------------------------------------------------
# Decoder forward (matches Decoder.forward of the PyTorch module, num_layers=1)
# ----------------------------------------------------------------------------
@jax.jit
def decoder_forward(params, x_tokens, encoder_states, hidden, cell):
    """x_tokens: (B,) int32; encoder_states: (T,B,2H); hidden/cell: (1,B,H).

    Returns (predictions (B,V), hidden (1,B,H), cell (1,B,H)).
    """
    B = x_tokens.shape[0]
    H = hidden.shape[-1]
    tok = x_tokens.astype(jnp.int32).reshape(B, 1)
    state = jnp.concatenate([hidden[0], cell[0]], axis=-1)          # (B, 2H) = [h | c]

    pred, state_new = _decoder_step(tok, params["embedding"], encoder_states,
                                    state, params["small"],
                                    params["w_lstm"], params["w_fc"])
    return pred, state_new[:, :H][None], state_new[:, H:][None]


# ----------------------------------------------------------------------------
if __name__ == "__main__":
    INPUT_SIZE = 128      # decoder input vocab (embedding rows)
    OUTPUT_SIZE = 128     # decoder output vocab (lane-dense fc output)
    EMBED = 32
    HIDDEN = 32
    NUM_LAYERS = 1        # module's attention only supports num_layers == 1
    SEQ = 8
    BATCH = 8

    key = jax.random.PRNGKey(0)
    k_par, k_x, k_enc, k_h, k_c = jax.random.split(key, 5)

    params = init_decoder_params(k_par, INPUT_SIZE, EMBED, HIDDEN, OUTPUT_SIZE)
    x = jax.random.randint(k_x, (BATCH,), 0, INPUT_SIZE, dtype=jnp.int32)
    encoder_states = jax.random.normal(k_enc, (SEQ, BATCH, 2 * HIDDEN), jnp.float32)
    hidden = jax.random.normal(k_h, (1, BATCH, HIDDEN), jnp.float32) * 0.1
    cell = jax.random.normal(k_c, (1, BATCH, HIDDEN), jnp.float32) * 0.1

    preds, h_new, c_new = decoder_forward(params, x, encoder_states, hidden, cell)
    jax.block_until_ready((preds, h_new, c_new))

    assert preds.shape == (BATCH, OUTPUT_SIZE)
    assert h_new.shape == (1, BATCH, HIDDEN)
    assert c_new.shape == (1, BATCH, HIDDEN)
    assert bool(jnp.all(jnp.isfinite(preds)))
    assert bool(jnp.all(jnp.isfinite(h_new)))
    assert bool(jnp.all(jnp.isfinite(c_new)))
    print("KERNEL_OK")
</pallas_src>

<mosaic_0001>
module attributes {stable_mosaic.version = 11 : i64} {
  func.func @_decoder_step_kernel(%arg0: memref<8x1xi32, #tpu.memory_space<vmem>>, %arg1: memref<128x32xbf16, #tpu.memory_space<vmem>>, %arg2: memref<8x8x64xf32, #tpu.memory_space<vmem>>, %arg3: memref<8x64xf32, #tpu.memory_space<vmem>>, %arg4: memref<3x128xf32, #tpu.memory_space<vmem>>, %arg5: memref<128x128xbf16, #tpu.memory_space<vmem>>, %arg6: memref<32x128xbf16, #tpu.memory_space<vmem>>, %arg7: memref<8x128xf32, #tpu.memory_space<vmem>>, %arg8: memref<8x64xf32, #tpu.memory_space<vmem>>, %arg9: memref<8x128xbf16, #tpu.memory_space<vmem>>) attributes {dimension_semantics = [], scalar_prefetch = 0 : i64, scratch_operands = 1 : i64, tpu.core_type = #tpu.core_type<tc>} {
    %c0 = arith.constant 0 : index
    %c0_0 = arith.constant 0 : index
    %0 = vector.load %arg3[%c0, %c0_0] : memref<8x64xf32, #tpu.memory_space<vmem>>, vector<8x32xf32>
    %c0_1 = arith.constant 0 : index
    %c32 = arith.constant 32 : index
    %1 = vector.load %arg3[%c0_1, %c32] : memref<8x64xf32, #tpu.memory_space<vmem>>, vector<8x32xf32>
    %c0_2 = arith.constant 0 : index
    %c0_3 = arith.constant 0 : index
    %c0_4 = arith.constant 0 : index
    %2 = vector.load %arg2[%c0_2, %c0_3, %c0_4] : memref<8x8x64xf32, #tpu.memory_space<vmem>>, vector<8x8x64xf32>
    %c0_5 = arith.constant 0 : index
    %c0_6 = arith.constant 0 : index
    %3 = vector.load %arg0[%c0_5, %c0_6] : memref<8x1xi32, #tpu.memory_space<vmem>>, vector<8x1xi32>
    %4 = tpu.iota {dimensions = array<i32: 1>} : vector<8x128xi32>
    %5 = vector.broadcast %3 : vector<8x1xi32> to vector<8x128xi32>
    %6 = arith.cmpi eq, %4, %5 : vector<8x128xi32>
    %cst = arith.constant 1.000000e+00 : f32
    %cst_7 = arith.constant 0.000000e+00 : f32
    %7 = vector.broadcast %cst : f32 to vector<8x128xf32>
    %8 = vector.broadcast %cst_7 : f32 to vector<8x128xf32>
    %9 = arith.select %6, %7, %8 : vector<8x128xi1>, vector<8x128xf32>
    %10 = arith.truncf %9 : vector<8x128xf32> to vector<8x128xbf16>
    %c0_8 = arith.constant 0 : index
    %c0_9 = arith.constant 0 : index
    %11 = vector.load %arg1[%c0_8, %c0_9] : memref<128x32xbf16, #tpu.memory_space<vmem>>, vector<128x32xbf16>
    %cst_10 = arith.constant dense<0.000000e+00> : vector<8x32xf32>
    %12 = tpu.matmul %10, %11, %cst_10 {dimension_numbers = #tpu.dot_dimension_numbers<[1], [0], [0], [1], [0, 0, 1, 1], [], []>} : vector<8x128xbf16>, vector<128x32xbf16>, vector<8x32xf32> -> vector<8x32xf32>
    %c0_11 = arith.constant 0 : index
    %c0_12 = arith.constant 0 : index
    %13 = vector.load %arg4[%c0_11, %c0_12] : memref<3x128xf32, #tpu.memory_space<vmem>>, vector<1x32xf32>
    %c0_13 = arith.constant 0 : index
    %c32_14 = arith.constant 32 : index
    %14 = vector.load %arg4[%c0_13, %c32_14] : memref<3x128xf32, #tpu.memory_space<vmem>>, vector<1x64xf32>
    %c0_15 = arith.constant 0 : index
    %c96 = arith.constant 96 : index
    %15 = vector.load %arg4[%c0_15, %c96] : memref<3x128xf32, #tpu.memory_space<vmem>>, vector<1x1xf32>
    %16 = vector.broadcast %13 : vector<1x32xf32> to vector<8x32xf32>
    %17 = arith.mulf %0, %16 : vector<8x32xf32>
    %cst_16 = arith.constant dense<0.000000e+00> : vector<8xf32>
    %18 = vector.multi_reduction <add>, %17, %cst_16 [1] : vector<8x32xf32> to vector<8xf32>
    %19 = vector.shape_cast %18 : vector<8xf32> to vector<8x1xf32>
    %20 = vector.shape_cast %14 : vector<1x64xf32> to vector<1x1x64xf32>
    %21 = vector.broadcast %20 : vector<1x1x64xf32> to vector<8x8x64xf32>
    %22 = arith.mulf %2, %21 : vector<8x8x64xf32>
    %cst_17 = arith.constant dense<0.000000e+00> : vector<8x8xf32>
    %23 = vector.multi_reduction <add>, %22, %cst_17 [2] : vector<8x8x64xf32> to vector<8x8xf32>
    %24 = vector.shape_cast %23 : vector<8x8xf32> to vector<8x8x1xf32>
    %25 = vector.shape_cast %19 : vector<8x1xf32> to vector<1x8x1xf32>
    %26 = vector.broadcast %25 : vector<1x8x1xf32> to vector<8x8x1xf32>
    %27 = arith.addf %24, %26 : vector<8x8x1xf32>
    %28 = vector.shape_cast %15 : vector<1x1xf32> to vector<1x1x1xf32>
    %29 = vector.broadcast %28 : vector<1x1x1xf32> to vector<8x8x1xf32>
    %30 = arith.addf %27, %29 : vector<8x8x1xf32>
    %cst_18 = arith.constant 0.000000e+00 : f32
    %31 = vector.broadcast %cst_18 : f32 to vector<8x8x1xf32>
    %32 = arith.maximumf %30, %31 : vector<8x8x1xf32>
    %cst_19 = arith.constant dense<0xFF800000> : vector<8x1xf32>
    %33 = vector.multi_reduction <maximumf>, %32, %cst_19 [0] : vector<8x8x1xf32> to vector<8x1xf32>
    %34 = vector.shape_cast %33 : vector<8x1xf32> to vector<1x8x1xf32>
    %35 = vector.broadcast %34 : vector<1x8x1xf32> to vector<8x8x1xf32>
    %36 = arith.subf %32, %35 : vector<8x8x1xf32>
    %37 = math.exp %36 : vector<8x8x1xf32>
    %cst_20 = arith.constant dense<0.000000e+00> : vector<8x1xf32>
    %38 = vector.multi_reduction <add>, %37, %cst_20 [0] : vector<8x8x1xf32> to vector<8x1xf32>
    %39 = vector.shape_cast %38 : vector<8x1xf32> to vector<1x8x1xf32>
    %40 = tpu.reciprocal %39 {approx = true} : vector<1x8x1xf32> -> vector<1x8x1xf32>
    %41 = vector.broadcast %40 : vector<1x8x1xf32> to vector<8x8x1xf32>
    %42 = arith.mulf %37, %41 : vector<8x8x1xf32>
    %43 = vector.broadcast %42 : vector<8x8x1xf32> to vector<8x8x64xf32>
    %44 = arith.mulf %43, %2 : vector<8x8x64xf32>
    %cst_21 = arith.constant dense<0.000000e+00> : vector<8x64xf32>
    %45 = vector.multi_reduction <add>, %44, %cst_21 [0] : vector<8x8x64xf32> to vector<8x64xf32>
    %46 = arith.truncf %45 : vector<8x64xf32> to vector<8x64xbf16>
    %c0_22 = arith.constant 0 : index
    %c0_23 = arith.constant 0 : index
    %47 = vector.load %arg9[%c0_22, %c0_23] : memref<8x128xbf16, #tpu.memory_space<vmem>>, vector<8x64xbf16>
    tpu.vector_store %arg9[%c0_22, %c0_23], %46 {strides = array<i32>} : memref<8x128xbf16, #tpu.memory_space<vmem>>, vector<8x64xbf16>,
    %48 = arith.truncf %12 : vector<8x32xf32> to vector<8x32xbf16>
    %c0_24 = arith.constant 0 : index
    %c64 = arith.constant 64 : index
    %49 = vector.load %arg9[%c0_24, %c64] : memref<8x128xbf16, #tpu.memory_space<vmem>>, vector<8x32xbf16>
    tpu.vector_store %arg9[%c0_24, %c64], %48 {strides = array<i32>} : memref<8x128xbf16, #tpu.memory_space<vmem>>, vector<8x32xbf16>,
    %50 = arith.truncf %0 : vector<8x32xf32> to vector<8x32xbf16>
    %c0_25 = arith.constant 0 : index
    %c96_26 = arith.constant 96 : index
    %51 = vector.load %arg9[%c0_25, %c96_26] : memref<8x128xbf16, #tpu.memory_space<vmem>>, vector<8x32xbf16>
    tpu.vector_store %arg9[%c0_25, %c96_26], %50 {strides = array<i32>} : memref<8x128xbf16, #tpu.memory_space<vmem>>, vector<8x32xbf16>,
    %c0_27 = arith.constant 0 : index
    %c0_28 = arith.constant 0 : index
    %52 = vector.load %arg9[%c0_27, %c0_28] : memref<8x128xbf16, #tpu.memory_space<vmem>>, vector<8x128xbf16>
    %c0_29 = arith.constant 0 : index
    %c0_30 = arith.constant 0 : index
    %53 = vector.load %arg5[%c0_29, %c0_30] : memref<128x128xbf16, #tpu.memory_space<vmem>>, vector<128x128xbf16>
    %cst_31 = arith.constant dense<0.000000e+00> : vector<8x128xf32>
    %54 = tpu.matmul %52, %53, %cst_31 {dimension_numbers = #tpu.dot_dimension_numbers<[1], [0], [0], [1], [0, 0, 1, 1], [], []>} : vector<8x128xbf16>, vector<128x128xbf16>, vector<8x128xf32> -> vector<8x128xf32>
    %c1 = arith.constant 1 : index
    %c0_32 = arith.constant 0 : index
    %55 = vector.load %arg4[%c1, %c0_32] : memref<3x128xf32, #tpu.memory_space<vmem>>, vector<1x128xf32>
    %56 = vector.broadcast %55 : vector<1x128xf32> to vector<8x128xf32>
    %57 = arith.addf %54, %56 : vector<8x128xf32>
    %58 = vector.extract_strided_slice %57 {offsets = [0, 0], sizes = [8, 32], strides = [1, 1]} : vector<8x128xf32> to vector<8x32xf32>
    %59 = arith.negf %58 : vector<8x32xf32>
    %60 = math.exp %59 : vector<8x32xf32>
    %cst_33 = arith.constant 1.000000e+00 : f32
    %61 = vector.broadcast %cst_33 : f32 to vector<8x32xf32>
    %62 = arith.addf %61, %60 : vector<8x32xf32>
    %63 = arith.divf %61, %62 : vector<8x32xf32>
    %64 = vector.extract_strided_slice %57 {offsets = [0, 32], sizes = [8, 32], strides = [1, 1]} : vector<8x128xf32> to vector<8x32xf32>
    %65 = arith.negf %64 : vector<8x32xf32>
    %66 = math.exp %65 : vector<8x32xf32>
    %cst_34 = arith.constant 1.000000e+00 : f32
    %67 = vector.broadcast %cst_34 : f32 to vector<8x32xf32>
    %68 = arith.addf %67, %66 : vector<8x32xf32>
    %69 = arith.divf %67, %68 : vector<8x32xf32>
    %70 = vector.extract_strided_slice %57 {offsets = [0, 64], sizes = [8, 32], strides = [1, 1]} : vector<8x128xf32> to vector<8x32xf32>
    %71 = math.tanh %70 : vector<8x32xf32>
    %72 = vector.extract_strided_slice %57 {offsets = [0, 96], sizes = [8, 32], strides = [1, 1]} : vector<8x128xf32> to vector<8x32xf32>
    %73 = arith.negf %72 : vector<8x32xf32>
    %74 = math.exp %73 : vector<8x32xf32>
    %cst_35 = arith.constant 1.000000e+00 : f32
    %75 = vector.broadcast %cst_35 : f32 to vector<8x32xf32>
    %76 = arith.addf %75, %74 : vector<8x32xf32>
    %77 = arith.divf %75, %76 : vector<8x32xf32>
    %78 = arith.mulf %69, %1 : vector<8x32xf32>
    %79 = arith.mulf %63, %71 : vector<8x32xf32>
    %80 = arith.addf %78, %79 : vector<8x32xf32>
    %81 = math.tanh %80 : vector<8x32xf32>
    %82 = arith.mulf %77, %81 : vector<8x32xf32>
    %83 = arith.truncf %82 : vector<8x32xf32> to vector<8x32xbf16>
    %c0_36 = arith.constant 0 : index
    %c0_37 = arith.constant 0 : index
    %84 = vector.load %arg6[%c0_36, %c0_37] : memref<32x128xbf16, #tpu.memory_space<vmem>>, vector<32x128xbf16>
    %cst_38 = arith.constant dense<0.000000e+00> : vector<8x128xf32>
    %85 = tpu.matmul %83, %84, %cst_38 {dimension_numbers = #tpu.dot_dimension_numbers<[1], [0], [0], [1], [0, 0, 1, 1], [], []>} : vector<8x32xbf16>, vector<32x128xbf16>, vector<8x128xf32> -> vector<8x128xf32>
    %c2 = arith.constant 2 : index
    %c0_39 = arith.constant 0 : index
    %86 = vector.load %arg4[%c2, %c0_39] : memref<3x128xf32, #tpu.memory_space<vmem>>, vector<1x128xf32>
    %87 = vector.broadcast %86 : vector<1x128xf32> to vector<8x128xf32>
    %88 = arith.addf %85, %87 : vector<8x128xf32>
    %c0_40 = arith.constant 0 : index
    %c0_41 = arith.constant 0 : index
    %89 = vector.load %arg7[%c0_40, %c0_41] : memref<8x128xf32, #tpu.memory_space<vmem>>, vector<8x128xf32>
    tpu.vector_store %arg7[%c0_40, %c0_41], %88 {strides = array<i32>} : memref<8x128xf32, #tpu.memory_space<vmem>>, vector<8x128xf32>,
    %c0_42 = arith.constant 0 : index
    %c0_43 = arith.constant 0 : index
    %90 = vector.load %arg8[%c0_42, %c0_43] : memref<8x64xf32, #tpu.memory_space<vmem>>, vector<8x32xf32>
    tpu.vector_store %arg8[%c0_42, %c0_43], %82 {strides = array<i32>} : memref<8x64xf32, #tpu.memory_space<vmem>>, vector<8x32xf32>,
    %c0_44 = arith.constant 0 : index
    %c32_45 = arith.constant 32 : index
    %91 = vector.load %arg8[%c0_44, %c32_45] : memref<8x64xf32, #tpu.memory_space<vmem>>, vector<8x32xf32>
    tpu.vector_store %arg8[%c0_44, %c32_45], %80 {strides = array<i32>} : memref<8x64xf32, #tpu.memory_space<vmem>>, vector<8x32xf32>,
    return
  }
}

</mosaic_0001>

<bundles_post_ra>
// kernel: decoder_forward.1
= control target key start
LH: loop header
LB: loop body
LE: loop exit
PB: predicated region body
PF: predicated region fallthrough
CT: control target
= control target key end

     0   :  { %14 = vsyncpa [#allocation4], 0  ;;  %s956_s0 = inlined_call_operand.vmem [shape: s32[8,1], index: 0, kind: input, shape index: {}]   ;;  %s957_s1 = inlined_call_operand.vmem [shape: bf16[128,32], index: 1, kind: input, shape index: {}]   ;;  %s958_s2 = inlined_call_operand.vmem [shape: f32[8,8,64], index: 2, kind: input, shape index: {}]   ;;  %s959_s3 = inlined_call_operand.vmem [shape: f32[8,64], index: 3, kind: input, shape index: {}, may-alias: {3,8}]   ;;  %s960_s4 = inlined_call_operand.vmem [shape: f32[3,128], index: 4, kind: input, shape index: {}]   ;;  %s961_s5 = inlined_call_operand.hbm [shape: bf16[128,128], index: 5, kind: input, shape index: {}]   ;;  %s962_s6 = inlined_call_operand.vmem [shape: bf16[32,128], index: 6, kind: input, shape index: {}]   ;;  %s963_s7 = inlined_call_operand.hbm [shape: f32[8,128], index: 7, kind: output, shape index: {0}]   ;;  %s964_s8 = inlined_call_operand.vmem [shape: f32[8,64], index: 8, kind: output, shape index: {1}, may-alias: {3,8}]  }
   0x1   :  { %15 = vsyncpa [#allocation5], 0  ;;  %s30_s29 = sshll.u32 %s961_s5, 4  ;;  %s725_s30 = smov [#allocation3]   ;;  %s31_s29 = int_to_ptr.hbm [resolvable:$true] %s30_s29 }
   0x2   :  { %s32_s9 = sshll.u32 %s725_s30, 4  ;;  %s726_s10 = smov 64   ;;  %s33_s9 = int_to_ptr.vmem [resolvable:$true] %s32_s9 }
   0x3   :  { %s727_s11 = smov 4  }
   0x4   :  { %38 = dma.hbm_to_vmem [thread:$0]  %s31_s29, 1024, %s33_s9, [#allocation4], %s726_s10, %s726_s10, %s727_s11  }
   0x5   :  { %721 = dma.done.wait [#allocation4], 1024  }
   0x6   :  { %722 = vsyncadd [#allocation4], 4294966272  ;;  %v728_v0 = vmov 0   ;;  %v55_v1 = vld [vmem:[%s956_s0] sm:$0xff]  ;;  %v620_v2 = vld [vmem:[%s957_s1 + $0x38] sm:$0xff]  ;;  %s729_s0 = smov 96   ;;  %v56_v14 = vlaneseq }
   0x7   :  { %640 = vset.pattern.permute.xlu0 %v728_v0  ;;  %128 = vmatpush.bf16.msra.mxu0 %v620_v2  ;;  %v619_v3 = vld [vmem:[%s957_s1 + $0x30] sm:$0xff]  ;;  %v796_v4 = vld [vmem:[%s960_s4] ss:$0 sm:$0xff]  ;;  %v618_v5 = vld [vmem:[%s957_s1 + $0x28] sm:$0xff]  ;;  %vm144_vm0 = vcmask 261120   ;;  %vm160_vm3 = vcmask 523264  }
   0x8   :  { %59 = vperm.xlu0 %640, %v55_v1   ;;  %v617_v6 = vld [vmem:[%s957_s1 + $0x20] sm:$0xff]  ;;  %v616_v7 = vld [vmem:[%s957_s1 + $0x18] sm:$0xff]  ;;  %v615_v8 = vld [vmem:[%s957_s1 + $0x10] sm:$0xff]  ;;  %v57_v15 = vand.u32 127, %v56_v14  ;;  %v730_v17 = vmov 1.0|1.0  }
   0x9   :  { %v614_v9 = vld [vmem:[%s957_s1 + $0x8] sm:$0xff]  ;;  %v613_v10 = vld [vmem:[%s957_s1] sm:$0xff]  ;;  %v829_v18 = vld [vmem:[%s958_s2 + $0x18] sm:$0xff]  ;;  %v731_v58 = vmov 96   ;;  %vm209_vm4 = vcmask 794368   ;;  %vm337_vm5 = vcmask 519168  }
   0xa   :  { %v821_v11 = vld [vmem:[%s959_s3] sm:$0xff]  ;;  %v834_v19 = vld [vmem:[%s958_s2 + $0x8] sm:$0xff]  ;;  %v850_v28 = vld [vmem:[%s958_s2 + $0x10] sm:$0xff]  ;;  %642 = vset.pattern.permute.xlu2 %v731_v58  ;;  %641 = vset.pattern.permute.xlu1 %v731_v58  ;;  %vm344_vm6 = vcmask 781824   ;;  %vm351_vm7 = vcmask 1044224   ;;  %s732_s25 = smov 32  }
   0xb   :  { %129 = vmatpush.bf16.msra.mxu0 %v619_v3  ;;  %v143_v12 = vmul.f32 %v796_v4, %v821_v11  ;;  %v839_v20 = vld [vmem:[%s958_s2] sm:$0xff]  ;;  %v864_v34 = vld [vmem:[%s958_s2 + $0x28] sm:$0xff]  ;;  %v869_v35 = vld [vmem:[%s958_s2 + $0x30] sm:$0xff]  ;;  %vm514_vm12 = vcmask 523520   ;;  %s733_s12 = smov [#allocation6]   ;;  %s523_s5 = sshll.u32 %s963_s7, 4  ;;  %s524_s5 = int_to_ptr.hbm [resolvable:$true] %s523_s5 }
   0xc   :  { %v855_v29 = vld [vmem:[%s958_s2 + $0x20] sm:$0xff]  ;;  %v878_v40 = vld [vmem:[%s958_s2 + $0x38] sm:$0xff]  ;;  %s521_s3 = sshll.u32 %s733_s12, 4  ;;  %s522_s3 = int_to_ptr.vmem [resolvable:$true] %s521_s3 }
   0xd   :  { %v145_v13 = vsel %vm144_vm0, %v143_v12, 0.0 }
   0xe   :  { %146 = vadd.xlane.f32.xlu1 %v145_v13 }
   0xf   :  { %130 = vmatpush.bf16.msra.mxu0 %v618_v5 }
  0x10   :  { %149 = vrot.lane.b32.xlu0 %v796_v4, %s729_s0 }
  0x11   :  { %643 = vset.pattern.permute.xlu0 %v731_v58 }
  0x13   :  { %131 = vmatpush.bf16.msra.mxu0 %v617_v6 }
  0x17   :  { %132 = vmatpush.bf16.msra.mxu0 %v616_v7 }
  0x1b   :  { %133 = vmatpush.bf16.msra.mxu0 %v615_v8 }
  0x1f   :  { %134 = vmatpush.bf16.msra.mxu0 %v614_v9 }
  0x23   :  { %135 = vmatpush.bf16.msra.mxu0 %v613_v10 }
  0x7a   :  { %v60_v16 = vpop.permute.xlu0 %59 }
  0x7b   :  { %vm61_vm1 = vcmp.eq.s32.totalorder %v57_v15, %v60_v16 }
  0x7c   :  { %vm569_vm2 = vmpackc.low %vm61_vm1, %vm61_vm1 }
  0x7d   :  { %570 = vmatmul.msk.bf16.vlgmr.msra.gmra.mxu0 %vm569_vm2, %v730_v17 }
  0x81   :  { %v147_v43 = vpop.xlane.xlu1 %146 }
  0x82   :  { %v150_v21 = vpop.permute.xlu0 %149 }
  0x83   :  { %v155_v22 = vmul.f32 %v150_v21, %v829_v18  ;;  %v153_v23 = vmul.f32 %v150_v21, %v834_v19  ;;  %v152_v24 = vmul.f32 %v150_v21, %v839_v20  ;;  %v154_v30 = vmul.f32 %v150_v21, %v850_v28 }
  0x84   :  { %v156_v31 = vmul.f32 %v150_v21, %v855_v29  ;;  %v157_v36 = vmul.f32 %v150_v21, %v864_v34  ;;  %v158_v37 = vmul.f32 %v150_v21, %v869_v35  ;;  %v159_v41 = vmul.f32 %v150_v21, %v878_v40 }
  0x85   :  { %v170_v25 = vsel %vm160_vm3, %v155_v22, 0.0  ;;  %v164_v26 = vsel %vm160_vm3, %v153_v23, 0.0  ;;  %v161_v27 = vsel %vm160_vm3, %v152_v24, 0.0  ;;  %v167_v32 = vsel %vm160_vm3, %v154_v30, 0.0 }
  0x86   :  { %171 = vadd.xlane.f32.xlu0 %v170_v25  ;;  %165 = vadd.xlane.f32.xlu2 %v164_v26  ;;  %v173_v33 = vsel %vm160_vm3, %v156_v31, 0.0  ;;  %v176_v38 = vsel %vm160_vm3, %v157_v36, 0.0  ;;  %v179_v39 = vsel %vm160_vm3, %v158_v37, 0.0  ;;  %v182_v42 = vsel %vm160_vm3, %v159_v41, 0.0 }
  0x87   :  { %162 = vadd.xlane.f32.xlu1 %v161_v27 }
  0x8e   :  { %168 = vadd.xlane.f32.xlu2 %v167_v32 }
  0x8f   :  { %174 = vadd.xlane.f32.xlu1 %v173_v33 }
  0x96   :  { %177 = vadd.xlane.f32.xlu2 %v176_v38 }
  0x97   :  { %180 = vadd.xlane.f32.xlu1 %v179_v39 }
  0x9e   :  { %183 = vadd.xlane.f32.xlu2 %v182_v42 }
  0xf9   :  { %v166_v44 = vpop.xlane.xlu2 %165  ;;  %v172_v50 = vpop.xlane.xlu0 %171 }
  0xfa   :  { %v163_v45 = vpop.xlane.xlu1 %162  ;;  %v882_v46 = vpop.f32.mrf.mxu0  ;;  %v186_v52 = vadd.f32 %v166_v44, %v147_v43  ;;  %v188_v56 = vadd.f32 %v172_v50, %v147_v43 }
  0xfb   :  { %v185_v59 = vadd.f32 %v163_v45, %v147_v43 }
  0xfc   :  { %v194_v62 = vadd.f32 %v796_v4, %v186_v52  ;;  %v196_v1 = vadd.f32 %v796_v4, %v188_v56 }
  0xfd   :  { %v193_v2 = vadd.f32 %v796_v4, %v185_v59 }
  0xfe   :  { %v202_v7 = vmax.f32 %v194_v62, 0.0  ;;  %v204_v12 = vmax.f32 %v196_v1, 0.0 }
  0xff   :  { %v201_v13 = vmax.f32 %v193_v2, 0.0 }
 0x100   :  { %v211_v17 = vsel %vm209_vm4, %v202_v7, -inf  ;;  %v213_v25 = vsel %vm209_vm4, %v204_v12, -inf }
 0x101   :  { %v169_v47 = vpop.xlane.xlu2 %168  ;;  %v210_v26 = vsel %vm209_vm4, %v201_v13, -inf }
 0x102   :  { %v175_v48 = vpop.xlane.xlu1 %174  ;;  %v139_v49 = vpop.f32.mrf.mxu0  ;;  %v187_v60 = vadd.f32 %v169_v47, %v147_v43 }
 0x103   :  { %v189_v53 = vadd.f32 %v175_v48, %v147_v43 }
 0x104   :  { %v195_v3 = vadd.f32 %v796_v4, %v187_v60 }
 0x105   :  { %v197_v63 = vadd.f32 %v796_v4, %v189_v53 }
 0x106   :  { %v203_v14 = vmax.f32 %v195_v3, 0.0 }
 0x107   :  { %v205_v8 = vmax.f32 %v197_v63, 0.0 }
 0x108   :  { %v212_v27 = vsel %vm209_vm4, %v203_v14, -inf }
 0x109   :  { %v178_v51 = vpop.xlane.xlu2 %177  ;;  %v214_v21 = vsel %vm209_vm4, %v205_v8, -inf }
 0x10a   :  { %v190_v54 = vadd.f32 %v178_v51, %v147_v43  ;;  %v181_v55 = vpop.xlane.xlu1 %180  ;;  %v215_v31 = vmax.f32 %v210_v26, %v214_v21 }
 0x10b   :  { %v191_v57 = vadd.f32 %v181_v55, %v147_v43 }
 0x10c   :  { %v198_v61 = vadd.f32 %v796_v4, %v190_v54 }
 0x10d   :  { %v199_v0 = vadd.f32 %v796_v4, %v191_v57 }
 0x10e   :  { %v206_v5 = vmax.f32 %v198_v61, 0.0 }
 0x10f   :  { %v207_v9 = vmax.f32 %v199_v0, 0.0 }
 0x110   :  { %v216_v15 = vsel %vm209_vm4, %v206_v5, -inf }
 0x111   :  { %v184_v6 = vpop.xlane.xlu2 %183  ;;  %v218_v22 = vsel %vm209_vm4, %v207_v9, -inf  ;;  %v217_v24 = vmax.f32 %v211_v17, %v216_v15 }
 0x112   :  { %v192_v10 = vadd.f32 %v184_v6, %v147_v43  ;;  %v219_v32 = vmax.f32 %v212_v27, %v218_v22 }
 0x114   :  { %v200_v16 = vadd.f32 %v796_v4, %v192_v10  ;;  %v222_v4 = vmax.f32 %v215_v31, %v217_v24  ;;  %v339_v31 = vpack.c.bf16 %v882_v46, %v882_v46 }
 0x116   :  { %v208_v23 = vmax.f32 %v200_v16, 0.0 }
 0x118   :  { %v220_v30 = vsel %vm209_vm4, %v208_v23, -inf }
 0x119   :  { %v221_v33 = vmax.f32 %v213_v25, %v220_v30 }
 0x11b   :  { %v223_v36 = vmax.f32 %v219_v32, %v221_v33  ;;  %v346_v32 = vpack.c.bf16 %v821_v11, %v821_v11  ;;  %v628_v33 = vld [vmem:[#allocation3 + $0x38] sm:$0xff] }
 0x11c   :  { %420 = vmatpush.bf16.msra.mxu1 %v628_v33 }
 0x11d   :  { %v224_v37 = vmax.f32 %v222_v4, %v223_v36  ;;  %v627_v4 = vld [vmem:[#allocation3 + $0x30] sm:$0xff]  ;;  %v626_v36 = vld [vmem:[#allocation3 + $0x28] sm:$0xff] }
 0x11f   :  { %v225_v38 = vsub.f32 %v201_v13, %v224_v37  ;;  %v226_v39 = vsub.f32 %v202_v7, %v224_v37  ;;  %v227_v41 = vsub.f32 %v203_v14, %v224_v37  ;;  %v228_v42 = vsub.f32 %v204_v12, %v224_v37 }
 0x120   :  { %v229_v43 = vsub.f32 %v205_v8, %v224_v37  ;;  %v230_v48 = vsub.f32 %v206_v5, %v224_v37  ;;  %v231_v50 = vsub.f32 %v207_v9, %v224_v37  ;;  %v232_v52 = vsub.f32 %v208_v23, %v224_v37  ;;  %421 = vmatpush.bf16.msra.mxu1 %v627_v4 }
 0x121   :  { %v233_v44 = vmul.f32 1.442695, %v225_v38  ;;  %v235_v45 = vmul.f32 1.442695, %v226_v39  ;;  %v237_v47 = vmul.f32 1.442695, %v227_v41 }
 0x122   :  { %v239_v49 = vmul.f32 1.442695, %v228_v42  ;;  %v241_v51 = vmul.f32 1.442695, %v229_v43  ;;  %v243_v53 = vmul.f32 1.442695, %v230_v48 }
 0x123   :  { %647 = vpow2.f32 %v233_v44  ;;  %v245_v54 = vmul.f32 1.442695, %v231_v50  ;;  %v247_v57 = vmul.f32 1.442695, %v232_v52  ;;  %v625_v38 = vld [vmem:[#allocation3 + $0x20] sm:$0xff]  ;;  %v624_v39 = vld [vmem:[#allocation3 + $0x18] sm:$0xff] }
 0x124   :  { %649 = vpow2.f32 %v235_v45  ;;  %422 = vmatpush.bf16.msra.mxu1 %v626_v36  ;;  %v623_v41 = vld [vmem:[#allocation3 + $0x10] sm:$0xff]  ;;  %v622_v42 = vld [vmem:[#allocation3 + $0x8] sm:$0xff] }
 0x125   :  { %651 = vpow2.f32 %v237_v47  ;;  %v621_v47 = vld [vmem:[#allocation3] sm:$0xff] }
 0x126   :  { %653 = vpow2.f32 %v239_v49 }
 0x127   :  { %655 = vpow2.f32 %v241_v51 }
 0x128   :  { %657 = vpow2.f32 %v243_v53  ;;  %423 = vmatpush.bf16.msra.mxu1 %v625_v38  ;;  %v630_v38 = vld [vmem:[%s962_s6 + $0x8] sm:$0xff] }
 0x129   :  { %v648_v55 = vpop.eup %647  ;;  %659 = vpow2.f32 %v245_v54  ;;  %501 = vmatpush.bf16.msra.mxu2 %v630_v38 }
 0x12a   :  { %v650_v56 = vpop.eup %649  ;;  %v249_v58 = vsel %vm209_vm4, %v648_v55, 0.0  ;;  %661 = vpow2.f32 %v247_v57 }
 0x12b   :  { %v652_v59 = vpop.eup %651  ;;  %v250_v60 = vsel %vm209_vm4, %v650_v56, 0.0 }
 0x12c   :  { %v654_v61 = vpop.eup %653  ;;  %v251_v62 = vadd.f32 %v250_v60, %v249_v58  ;;  %v252_v63 = vsel %vm209_vm4, %v652_v59, 0.0  ;;  %424 = vmatpush.bf16.msra.mxu1 %v624_v39  ;;  %v629_v39 = vld [vmem:[%s962_s6] sm:$0xff] }
 0x12d   :  { %v656_v0 = vpop.eup %655  ;;  %v254_v2 = vsel %vm209_vm4, %v654_v61, 0.0  ;;  %502 = vmatpush.bf16.msra.mxu2 %v629_v39 }
 0x12e   :  { %v253_v1 = vadd.f32 %v252_v63, %v251_v62  ;;  %v658_v3 = vpop.eup %657  ;;  %v256_v6 = vsel %vm209_vm4, %v656_v0, 0.0 }
 0x12f   :  { %v660_v7 = vpop.eup %659  ;;  %v258_v9 = vsel %vm209_vm4, %v658_v3, 0.0 }
 0x130   :  { %v255_v5 = vadd.f32 %v254_v2, %v253_v1  ;;  %v662_v10 = vpop.eup %661  ;;  %v260_v13 = vsel %vm209_vm4, %v660_v7, 0.0  ;;  %425 = vmatpush.bf16.msra.mxu1 %v623_v41 }
 0x131   :  { %v262_v15 = vsel %vm209_vm4, %v662_v10, 0.0 }
 0x132   :  { %v257_v8 = vadd.f32 %v256_v6, %v255_v5 }
 0x134   :  { %v259_v12 = vadd.f32 %v258_v9, %v257_v8  ;;  %426 = vmatpush.bf16.msra.mxu1 %v622_v42 }
 0x136   :  { %v261_v14 = vadd.f32 %v260_v13, %v259_v12 }
 0x138   :  { %v263_v16 = vadd.f32 %v262_v15, %v261_v14  ;;  %427 = vmatpush.bf16.msra.mxu1 %v621_v47 }
 0x13a   :  { %663 = vrcp.f32 %v263_v16 }
 0x140   :  { %v664_v17 = vpop.eup %663 }
 0x141   :  { %v269_v21 = vmul.f32 %v664_v17, %v656_v0  ;;  %v266_v22 = vmul.f32 %v664_v17, %v650_v56  ;;  %v265_v23 = vmul.f32 %v664_v17, %v648_v55  ;;  %v267_v24 = vmul.f32 %v664_v17, %v652_v59 }
 0x142   :  { %v268_v25 = vmul.f32 %v664_v17, %v654_v61  ;;  %v270_v26 = vmul.f32 %v664_v17, %v658_v3  ;;  %v271_v27 = vmul.f32 %v664_v17, %v660_v7  ;;  %v272_v30 = vmul.f32 %v664_v17, %v662_v10 }
 0x143   :  { %295 = vperm.xlu0 %643, %v269_v21   ;;  %280 = vperm.xlu2 %642, %v266_v22  }
 0x144   :  { %275 = vperm.xlu1 %641, %v265_v23  }
 0x14b   :  { %285 = vperm.xlu2 %642, %v267_v24  }
 0x14c   :  { %290 = vperm.xlu1 %641, %v268_v25  }
 0x153   :  { %300 = vperm.xlu2 %642, %v270_v26  }
 0x154   :  { %305 = vperm.xlu1 %641, %v271_v27  }
 0x15b   :  { %310 = vperm.xlu2 %642, %v272_v30  }
 0x15c   :  { %341 = vrot.lane.b32.xlu1 %v339_v31, %s726_s10 }
 0x163   :  { %348 = vrot.lane.b32.xlu2 %v346_v32, %s729_s0 }
 0x19d   :  { %v281_v37 = vpop.permute.xlu2 %280 }
 0x19e   :  { %v314_v44 = vmul.f32 %v281_v37, %v834_v19 }
 0x1a0   :  { %v322_v50 = vsel %vm160_vm3, %v314_v44, 0.0  ;;  %v646_v44 = vld [vmem:[%s960_s4 + $0x2] ss:$0 sm:$0xff] }
 0x1a5   :  { %v286_v46 = vpop.permute.xlu2 %285 }
 0x1a6   :  { %v315_v51 = vmul.f32 %v286_v46, %v850_v28 }
 0x1a8   :  { %v324_v55 = vsel %vm160_vm3, %v315_v51, 0.0 }
 0x1ad   :  { %v301_v49 = vpop.permute.xlu2 %300 }
 0x1ae   :  { %v318_v59 = vmul.f32 %v301_v49, %v864_v34 }
 0x1b0   :  { %v330_v63 = vsel %vm160_vm3, %v318_v59, 0.0 }
 0x1b5   :  { %v296_v52 = vpop.permute.xlu0 %295  ;;  %v311_v61 = vpop.permute.xlu2 %310 }
 0x1b6   :  { %v276_v43 = vpop.permute.xlu1 %275  ;;  %v317_v56 = vmul.f32 %v296_v52, %v855_v29  ;;  %v320_v0 = vmul.f32 %v311_v61, %v878_v40 }
 0x1b7   :  { %v313_v45 = vmul.f32 %v276_v43, %v839_v20 }
 0x1b8   :  { %v328_v60 = vsel %vm160_vm3, %v317_v56, 0.0  ;;  %v334_v3 = vsel %vm160_vm3, %v320_v0, 0.0 }
 0x1b9   :  { %v321_v48 = vsel %vm160_vm3, %v313_v45, 0.0 }
 0x1ba   :  { %v323_v53 = vadd.f32 %v322_v50, %v321_v48 }
 0x1bc   :  { %v325_v20 = vadd.f32 %v324_v55, %v323_v53 }
 0x1bd   :  { %v349_v6 = vpop.permute.xlu2 %348 }
 0x1be   :  { %v291_v54 = vpop.permute.xlu1 %290 }
 0x1bf   :  { %v316_v19 = vmul.f32 %v291_v54, %v829_v18 }
 0x1c1   :  { %v326_v57 = vsel %vm160_vm3, %v316_v19, 0.0 }
 0x1c2   :  { %v327_v58 = vadd.f32 %v326_v57, %v325_v20 }
 0x1c4   :  { %v329_v28 = vadd.f32 %v328_v60, %v327_v58 }
 0x1c6   :  { %v306_v62 = vpop.permute.xlu1 %305  ;;  %v331_v29 = vadd.f32 %v330_v63, %v329_v28 }
 0x1c7   :  { %v319_v1 = vmul.f32 %v306_v62, %v869_v35  ;;  %v645_v35 = vld [vmem:[%s960_s4 + $0x1] ss:$0 sm:$0xff] }
 0x1c9   :  { %v332_v18 = vsel %vm160_vm3, %v319_v1, 0.0 }
 0x1ca   :  { %v333_v2 = vadd.f32 %v332_v18, %v331_v29 }
 0x1cc   :  { %v335_v5 = vadd.f32 %v334_v3, %v333_v2 }
 0x1ce   :  { %v336_v34 = vpack.c.bf16 %v335_v5, %v335_v5  ;;  %v342_v7 = vpop.permute.xlu1 %341 }
 0x1d0   :  { %338 = vst.msk [vmem:[#allocation2] sm:$0xf] %vm337_vm5, %v336_v34 }
 0x1d1   :  { %345 = vst.msk [vmem:[#allocation2] sm:$0xf] %vm344_vm6, %v342_v7 }
 0x1d2   :  { %352 = vst.msk [vmem:[#allocation2] sm:$0xf] %vm351_vm7, %v349_v6 }
 0x1d9   :  { %v353_v8 = vld [vmem:[#allocation2] sm:$0xf] }
 0x1da   :  { %428 = vmatmul.bf16.vlgmr.msra.gmra.mxu1 %v353_v8 }
 0x257   :  { %v429_v40 = vpop.f32.mrf.mxu1 }
 0x258   :  { %v430_v9 = vadd.f32 %v645_v35, %v429_v40 }
 0x25a   :  { %665 = vtanh.f32 %v430_v9  ;;  %v603_v13 = vmul.f32 -1.442695, %v430_v9 }
 0x25c   :  { %667 = vpow2.f32 %v603_v13 }
 0x25f   :  { %v431_v10 = vpop.f32.mrf.mxu1 }
 0x260   :  { %v666_v12 = vpop.eup %665 }
 0x261   :  { %455 = vrot.lane.b32.xlu1 %v666_v12, %s726_s10 }
 0x262   :  { %v668_v14 = vpop.eup %667 }
 0x263   :  { %v436_v15 = vadd.f32 1.0, %v668_v14 }
 0x265   :  { %669 = vrcp.f32 %v436_v15  ;;  %v448_v24 = vand.u32 2147483648, %v436_v15  ;;  %vm442_vm9 = vweird.f32 %v436_v15  ;;  %v446_v25 = vand.u32 2147483647, %v436_v15 }
 0x267   :  { %v449_v27 = vor.u32 1.1754944e-38, %v448_v24  ;;  %vm447_vm11 = vcmp.eq.f32.partialorder %v446_v25, 8.507059e+37 }
 0x26b   :  { %v670_v16 = vpop.eup %669 }
 0x26c   :  { %v438_v17 = vmul.f32 %v670_v16, %v436_v15  ;;  %vm443_vm8 = vweird.f32 %v670_v16 }
 0x26d   :  { %vm444_vm10 = vmor %vm442_vm9, %vm443_vm8 }
 0x26e   :  { %v439_v21 = vsub.f32 1.0, %v438_v17 }
 0x270   :  { %v440_v22 = vmul.f32 %v670_v16, %v439_v21 }
 0x272   :  { %v441_v23 = vadd.f32 %v670_v16, %v440_v22 }
 0x274   :  { %v445_v26 = vsel %vm444_vm10, %v670_v16, %v441_v23 }
 0x275   :  { %v450_v31 = vsel %vm447_vm11, %v449_v27, %v445_v26 }
 0x276   :  { %v453_v33 = vmul.f32 %v450_v31, %v821_v11 }
 0x2d3   :  { %v456_v30 = vpop.permute.xlu1 %455 }
 0x2d4   :  { %v458_v32 = vmul.f32 %v456_v30, %v450_v31 }
 0x2d6   :  { %460 = vrot.lane.b32.xlu2 %v458_v32, %s732_s25 }
 0x330   :  { %v461_v4 = vpop.permute.xlu2 %460 }
 0x331   :  { %v463_v36 = vadd.f32 %v461_v4, %v453_v33 }
 0x333   :  { %671 = vtanh.f32 %v463_v36 }
 0x339   :  { %v672_v37 = vpop.eup %671 }
 0x33a   :  { %466 = vrot.lane.b32.xlu1 %v672_v37, %s726_s10 }
 0x3ac   :  { %v467_v46 = vpop.permute.xlu1 %466 }
 0x3ad   :  { %v469_v41 = vmul.f32 %v467_v46, %v450_v31 }
 0x3af   :  { %v470_v42 = vpack.c.bf16 %v469_v41, %v469_v41  ;;  %510 = vrot.lane.b32.xlu1 %v469_v41, %s732_s25 }
 0x3b1   :  { %478 = vrot.lane.b32.xlu2 %v470_v42, %s732_s25 }
 0x40b   :  { %v479_v11 = vpop.permute.xlu2 %478 }
 0x40c   :  { %612 = vmatmul.msk.bf16.vlgmr.msra.gmra.mxu2 %vm144_vm0, %v479_v11 }
 0x421   :  { %v511_v43 = vpop.permute.xlu1 %510 }
 0x422   :  { %513 = vst.msk [vmem:[%s964_s8] sm:$0xff] %vm144_vm0, %v511_v43 }
 0x423   :  { %515 = vst.msk [vmem:[%s964_s8] sm:$0xff] %vm514_vm12, %v463_v36 }
 0x48f   :  { %v504_v45 = vpop.f32.mrf.mxu2 }
 0x490   :  { %v505_v47 = vadd.f32 %v646_v44, %v504_v45 }
 0x492   :  { %508 = vst [vmem:[#allocation6] sm:$0xff] %v505_v47 }
 0x493   :  { %526 = dma.vmem_to_hbm [thread:$0]  %s522_s3, 128, %s524_s5, [#allocation5]  }
 0x497   :  { %v506_v48 = vpop.f32.mrf.mxu2 }
 0x498   :  { %723 = dma.done.wait [#allocation5], 128  }
 0x499   :  { %724 = vsyncadd [#allocation5], 4294967168 }
 0x49a   :  { %535 = vsyncpa [#allocation4], 1 }
 0x49b   :  { %536 = vsyncpa [#allocation5], 1 }

</bundles_post_ra>
